<compile_context>
chip_gen: v5e
topology: v5e:2x2
jax: 0.10.0
libtpu: 0.0.40
codegen_flags: <defaults>
</compile_context>

<pallas_src>
import math
import jax
import jax.numpy as jnp
from jax.experimental import pallas as pl
from jax.experimental.pallas import tpu as pltpu

PI = 3.141592653589793

# Slab indices inside the packed [15, B, D] array.
#   head:     0 emb_E   1 emb_TE   2 beta_E   3 omega_E   4 emb_E_var
#   tail:     5 emb_E   6 emb_TE   7 beta_E   8 omega_E   9 emb_E_var
#   relation: 10 emb_R  11 emb_TR  12 beta_R  13 omega_R  14 emb_R_var


# ----------------------------- Pallas kernel ------------------------------ #
def atise_kernel(scal_ref, emb_ref, out_ref):
    """scal_ref: [TB, 4] (d, alpha_h, alpha_t, alpha_r)
       emb_ref : [15, TB, D] packed embedding rows
       out_ref : [TB, 1] scores."""
    f32 = jnp.float32

    s = scal_ref[...].astype(f32)                   # [TB, 4]
    d = s[:, 0:1]                                   # [TB, 1]
    two_pi_d = (2.0 * PI) * d                       # hoisted once

    def slab(k):                                    # [TB, D]
        return emb_ref[k].astype(f32)

    def time_mean(base, alpha_col):
        # e + (d*alpha) * te + beta * sin(2*pi*d * omega)
        da = d * s[:, alpha_col:alpha_col + 1]      # fold scalar product first
        return (slab(base)
                + da * slab(base + 1)
                + slab(base + 2) * jnp.sin(two_pi_d * slab(base + 3)))

    h_mean = time_mean(0, 1)
    t_mean = time_mean(5, 2)
    r_mean = time_mean(10, 3)
    h_var, t_var, r_var = slab(4), slab(9), slab(14)

    ht_var = h_var + t_var
    diff = r_mean - h_mean + t_mean                 # (h-t-r) == -diff -> same square
    sq = diff * diff

    # Exact reciprocals (pl.reciprocal(x, approx=True) would offload to the EUP,
    # but exact divide keeps bit-level agreement with the f32 torch math; the
    # kernel is HBM-bound so this costs nothing).
    inv_r = 1.0 / r_var
    inv_ht = 1.0 / ht_var

    dim = f32(emb_ref.shape[-1])
    out1 = jnp.sum((ht_var + sq) * inv_r, axis=1, keepdims=True) - dim
    out2 = jnp.sum((r_var + sq) * inv_ht, axis=1, keepdims=True) - dim

    # TODO(synk): output block stays (TB, 1); a lane-dense (1, TB) store is a
    # <0.25%-of-traffic optimization here and needs a sublane->lane relayout.
    out_ref[...] = (out1 + out2) * 0.25


# ------------------------------ JAX wrapper -------------------------------- #
def _round_up(x, m):
    return ((x + m - 1) // m) * m


def _choose_batch_tile(B, D, itemsize, requested):
    # Double-buffered packed input must fit comfortably in scoped VMEM
    # (v7x default scoped VMEM is 32 MiB of 64 MiB physical -> budget ~24 MiB).
    vmem_budget = 24 * 1024 * 1024
    per_row = 15 * D * itemsize * 2 + 4 * 4 * 2 + 8   # packed + scalars + out
    max_rows = max(8, vmem_budget // max(per_row, 1))
    tb = min(requested, max_rows)
    # For large batches keep >= 4 grid steps so v7x's two TensorCores both
    # get work (don't shrink below 256 rows to do it).
    if B // 4 >= 256:
        tb = min(tb, B // 4)
    tb = min(tb, _round_up(B, 8))
    tb = max(8, (tb // 8) * 8)
    return tb


def atise_forward(params, h_i, t_i, r_i, d_i, *, batch_tile=512,
                  io_dtype=jnp.float32):
    """Scores a batch of (h, t, r, d) quadruples. Returns shape [B] float32.

    io_dtype=jnp.bfloat16 halves HBM bytes of the packed embedding block
    (memory-bound kernel); default float32 matches torch numerics exactly.
    """
    B0 = h_i.shape[0]
    D = params["emb_E"].shape[1]
    itemsize = jnp.dtype(io_dtype).itemsize

    tb = _choose_batch_tile(B0, D, itemsize, batch_tile)
    Bp = _round_up(B0, tb)

    # Pad the batch (edge mode -> valid rows, results sliced off afterwards).
    if Bp != B0:
        pad = (0, Bp - B0)
        h_i = jnp.pad(h_i, pad, mode="edge")
        t_i = jnp.pad(t_i, pad, mode="edge")
        r_i = jnp.pad(r_i, pad, mode="edge")
        d_i = jnp.pad(d_i, pad, mode="edge")

    take = lambda w, idx: jnp.take(w, idx, axis=0)   # gather = glue indexing

    # One packed [15, Bp, D] slab: a single big, lane-contiguous DMA per step.
    packed = jnp.stack(
        [
            take(params["emb_E"], h_i), take(params["emb_TE"], h_i),
            take(params["beta_E"], h_i), take(params["omega_E"], h_i),
            take(params["emb_E_var"], h_i),
            take(params["emb_E"], t_i), take(params["emb_TE"], t_i),
            take(params["beta_E"], t_i), take(params["omega_E"], t_i),
            take(params["emb_E_var"], t_i),
            take(params["emb_R"], r_i), take(params["emb_TR"], r_i),
            take(params["beta_R"], r_i), take(params["omega_R"], r_i),
            take(params["emb_R_var"], r_i),
        ],
        axis=0,
    ).astype(io_dtype)

    # One packed [Bp, 4] scalar block: d, alpha_h, alpha_t, alpha_r.
    scal = jnp.concatenate(
        [
            d_i.reshape(Bp, 1).astype(jnp.float32),
            take(params["alpha_E"], h_i).astype(jnp.float32),
            take(params["alpha_E"], t_i).astype(jnp.float32),
            take(params["alpha_R"], r_i).astype(jnp.float32),
        ],
        axis=1,
    )

    out = pl.pallas_call(
        atise_kernel,
        out_shape=jax.ShapeDtypeStruct((Bp, 1), jnp.float32),
        grid_spec=pltpu.PrefetchScalarGridSpec(
            num_scalar_prefetch=0,
            grid=(Bp // tb,),
            in_specs=[
                pl.BlockSpec((tb, 4), lambda i: (i, 0)),
                pl.BlockSpec((15, tb, D), lambda i: (0, i, 0)),
            ],
            out_specs=pl.BlockSpec((tb, 1), lambda i: (i, 0)),
        ),
        compiler_params=pltpu.CompilerParams(
            dimension_semantics=("parallel",)),
    )(scal, packed)
    return out[:B0, 0]


# --------------------------- parameter creation ----------------------------- #
def _renorm_rows(w, maxnorm=1.0):
    # torch renorm_(p=2, dim=0, maxnorm=1): scale rows whose L2 norm > maxnorm.
    norm = jnp.sqrt(jnp.sum(w * w, axis=1, keepdims=True))
    scale = jnp.where(norm > maxnorm, maxnorm / (norm + 1e-7), 1.0)
    return w * scale


def init_params(key, n_entity, n_relation, embedding_dim, cmin, cmax):
    r = 6.0 / math.sqrt(embedding_dim)
    ks = jax.random.split(key, 8)
    u = lambda k, shape, lo, hi: jax.random.uniform(
        k, shape, dtype=jnp.float32, minval=lo, maxval=hi)

    def pad0(w):  # padding_idx=0
        return w.at[0].set(0.0)

    return {
        "emb_E":     pad0(_renorm_rows(u(ks[0], (n_entity, embedding_dim), -r, r))),
        "emb_R":     pad0(_renorm_rows(u(ks[1], (n_relation, embedding_dim), -r, r))),
        "emb_TE":    pad0(_renorm_rows(u(ks[2], (n_entity, embedding_dim), -r, r))),
        "emb_TR":    pad0(_renorm_rows(u(ks[3], (n_relation, embedding_dim), -r, r))),
        "emb_E_var": pad0(u(ks[4], (n_entity, embedding_dim), cmin, cmax)),
        "emb_R_var": pad0(u(ks[5], (n_relation, embedding_dim), cmin, cmax)),
        "omega_E":   pad0(u(ks[6], (n_entity, embedding_dim), -r, r)),
        "omega_R":   pad0(u(ks[7], (n_relation, embedding_dim), -r, r)),
        "alpha_E":   jnp.zeros((n_entity, 1), jnp.float32),
        "alpha_R":   jnp.zeros((n_relation, 1), jnp.float32),
        "beta_E":    jnp.zeros((n_entity, embedding_dim), jnp.float32),
        "beta_R":    jnp.zeros((n_relation, embedding_dim), jnp.float32),
    }


# -------------------------- pure-JAX reference ------------------------------ #
def atise_ref(params, h_i, t_i, r_i, d_i):
    D = params["emb_E"].shape[1]
    d = d_i.reshape(-1, 1).astype(jnp.float32)
    two_pi_d = (2.0 * PI) * d

    def mean(E, A, TE, B_, OM, idx):
        return (E[idx] + d * A[idx] * TE[idx]
                + B_[idx] * jnp.sin(two_pi_d * OM[idx]))

    h_mean = mean(params["emb_E"], params["alpha_E"], params["emb_TE"],
                  params["beta_E"], params["omega_E"], h_i)
    t_mean = mean(params["emb_E"], params["alpha_E"], params["emb_TE"],
                  params["beta_E"], params["omega_E"], t_i)
    r_mean = mean(params["emb_R"], params["alpha_R"], params["emb_TR"],
                  params["beta_R"], params["omega_R"], r_i)
    h_var = params["emb_E_var"][h_i]
    t_var = params["emb_E_var"][t_i]
    r_var = params["emb_R_var"][r_i]
    out1 = (jnp.sum((h_var + t_var) / r_var, 1)
            + jnp.sum((r_mean - h_mean + t_mean) ** 2 / r_var, 1) - D)
    out2 = (jnp.sum(r_var / (h_var + t_var), 1)
            + jnp.sum((h_mean - t_mean - r_mean) ** 2 / (h_var + t_var), 1) - D)
    return (out1 + out2) / 4.0


# --------------------------------- main ------------------------------------- #
if __name__ == "__main__":
    n_entity, n_relation, D = 32, 8, 32
    cmin, cmax = 0.003, 0.3

    key = jax.random.PRNGKey(0)
    kp, kh, kt, kr, kd, kx = jax.random.split(key, 6)
    params = init_params(kp, n_entity, n_relation, D, cmin, cmax)

    # ---- test 1: faithful init (alpha/beta = 0, as in the torch module) ----
    B = 8
    h_i = jax.random.randint(kh, (B,), 1, n_entity, dtype=jnp.int32)
    t_i = jax.random.randint(kt, (B,), 1, n_entity, dtype=jnp.int32)
    r_i = jax.random.randint(kr, (B,), 1, n_relation, dtype=jnp.int32)
    d_i = jax.random.uniform(kd, (B,), dtype=jnp.float32, minval=0.0, maxval=365.0)

    out = jax.block_until_ready(atise_forward(params, h_i, t_i, r_i, d_i))
    ref = atise_ref(params, h_i, t_i, r_i, d_i)
    assert out.shape == (B,)
    assert jnp.allclose(out, ref, rtol=1e-4, atol=1e-3), (out, ref)

    # ---- test 2: non-zero alpha/beta, non-multiple-of-8 batch, >1 grid step ----
    ks = jax.random.split(kx, 8)
    params2 = dict(params)
    params2["alpha_E"] = jax.random.uniform(ks[0], (n_entity, 1), jnp.float32, -0.01, 0.01)
    params2["alpha_R"] = jax.random.uniform(ks[1], (n_relation, 1), jnp.float32, -0.01, 0.01)
    params2["beta_E"] = jax.random.uniform(ks[2], (n_entity, D), jnp.float32, -0.5, 0.5)
    params2["beta_R"] = jax.random.uniform(ks[3], (n_relation, D), jnp.float32, -0.5, 0.5)

    B2 = 100
    h2 = jax.random.randint(ks[4], (B2,), 1, n_entity, dtype=jnp.int32)
    t2 = jax.random.randint(ks[5], (B2,), 1, n_entity, dtype=jnp.int32)
    r2 = jax.random.randint(ks[6], (B2,), 1, n_relation, dtype=jnp.int32)
    d2 = jax.random.uniform(ks[7], (B2,), dtype=jnp.float32, minval=0.0, maxval=4.0)

    out2 = jax.block_until_ready(
        atise_forward(params2, h2, t2, r2, d2, batch_tile=24))   # padded, 5 grid steps
    ref2 = atise_ref(params2, h2, t2, r2, d2)
    assert out2.shape == (B2,)
    assert jnp.allclose(out2, ref2, rtol=1e-4, atol=1e-2), (out2, ref2)

    print("KERNEL_OK")
</pallas_src>

<mosaic_0001>
module attributes {stable_mosaic.version = 11 : i64} {
  func.func @atise_kernel(%arg0: i32, %arg1: memref<8x4xf32, #tpu.memory_space<vmem>>, %arg2: memref<15x8x32xf32, #tpu.memory_space<vmem>>, %arg3: memref<8x1xf32, #tpu.memory_space<vmem>>) attributes {dimension_semantics = [#tpu.dimension_semantics<parallel>], iteration_bounds = array<i64: 1>, scalar_prefetch = 0 : i64, scratch_operands = 0 : i64, tpu.core_type = #tpu.core_type<tc>, window_params = [{transform_indices = @transform_0, window_bounds = array<i64: 8, 4>}, {transform_indices = @transform_1, window_bounds = array<i64: 15, 8, 32>}, {transform_indices = @transform_2, window_bounds = array<i64: 8, 1>}]} {
    %c0 = arith.constant 0 : index
    %c0_0 = arith.constant 0 : index
    %0 = vector.load %arg1[%c0, %c0_0] : memref<8x4xf32, #tpu.memory_space<vmem>>, vector<8x4xf32>
    %1 = vector.extract_strided_slice %0 {offsets = [0, 0], sizes = [8, 1], strides = [1, 1]} : vector<8x4xf32> to vector<8x1xf32>
    %cst = arith.constant 6.28318548 : f32
    %2 = vector.broadcast %cst : f32 to vector<8x1xf32>
    %3 = arith.mulf %2, %1 : vector<8x1xf32>
    %4 = vector.extract_strided_slice %0 {offsets = [0, 1], sizes = [8, 1], strides = [1, 1]} : vector<8x4xf32> to vector<8x1xf32>
    %5 = arith.mulf %1, %4 : vector<8x1xf32>
    %c0_1 = arith.constant 0 : index
    %c0_2 = arith.constant 0 : index
    %c0_3 = arith.constant 0 : index
    %6 = vector.load %arg2[%c0_1, %c0_2, %c0_3] : memref<15x8x32xf32, #tpu.memory_space<vmem>>, vector<1x8x32xf32>
    %7 = vector.shape_cast %6 : vector<1x8x32xf32> to vector<8x32xf32>
    %c1 = arith.constant 1 : index
    %c0_4 = arith.constant 0 : index
    %c0_5 = arith.constant 0 : index
    %8 = vector.load %arg2[%c1, %c0_4, %c0_5] : memref<15x8x32xf32, #tpu.memory_space<vmem>>, vector<1x8x32xf32>
    %9 = vector.shape_cast %8 : vector<1x8x32xf32> to vector<8x32xf32>
    %10 = vector.broadcast %5 : vector<8x1xf32> to vector<8x32xf32>
    %11 = arith.mulf %10, %9 : vector<8x32xf32>
    %12 = arith.addf %7, %11 : vector<8x32xf32>
    %c2 = arith.constant 2 : index
    %c0_6 = arith.constant 0 : index
    %c0_7 = arith.constant 0 : index
    %13 = vector.load %arg2[%c2, %c0_6, %c0_7] : memref<15x8x32xf32, #tpu.memory_space<vmem>>, vector<1x8x32xf32>
    %14 = vector.shape_cast %13 : vector<1x8x32xf32> to vector<8x32xf32>
    %c3 = arith.constant 3 : index
    %c0_8 = arith.constant 0 : index
    %c0_9 = arith.constant 0 : index
    %15 = vector.load %arg2[%c3, %c0_8, %c0_9] : memref<15x8x32xf32, #tpu.memory_space<vmem>>, vector<1x8x32xf32>
    %16 = vector.shape_cast %15 : vector<1x8x32xf32> to vector<8x32xf32>
    %17 = vector.broadcast %3 : vector<8x1xf32> to vector<8x32xf32>
    %18 = arith.mulf %17, %16 : vector<8x32xf32>
    %19 = math.sin %18 : vector<8x32xf32>
    %20 = arith.mulf %14, %19 : vector<8x32xf32>
    %21 = arith.addf %12, %20 : vector<8x32xf32>
    %22 = vector.extract_strided_slice %0 {offsets = [0, 2], sizes = [8, 1], strides = [1, 1]} : vector<8x4xf32> to vector<8x1xf32>
    %23 = arith.mulf %1, %22 : vector<8x1xf32>
    %c5 = arith.constant 5 : index
    %c0_10 = arith.constant 0 : index
    %c0_11 = arith.constant 0 : index
    %24 = vector.load %arg2[%c5, %c0_10, %c0_11] : memref<15x8x32xf32, #tpu.memory_space<vmem>>, vector<1x8x32xf32>
    %25 = vector.shape_cast %24 : vector<1x8x32xf32> to vector<8x32xf32>
    %c6 = arith.constant 6 : index
    %c0_12 = arith.constant 0 : index
    %c0_13 = arith.constant 0 : index
    %26 = vector.load %arg2[%c6, %c0_12, %c0_13] : memref<15x8x32xf32, #tpu.memory_space<vmem>>, vector<1x8x32xf32>
    %27 = vector.shape_cast %26 : vector<1x8x32xf32> to vector<8x32xf32>
    %28 = vector.broadcast %23 : vector<8x1xf32> to vector<8x32xf32>
    %29 = arith.mulf %28, %27 : vector<8x32xf32>
    %30 = arith.addf %25, %29 : vector<8x32xf32>
    %c7 = arith.constant 7 : index
    %c0_14 = arith.constant 0 : index
    %c0_15 = arith.constant 0 : index
    %31 = vector.load %arg2[%c7, %c0_14, %c0_15] : memref<15x8x32xf32, #tpu.memory_space<vmem>>, vector<1x8x32xf32>
    %32 = vector.shape_cast %31 : vector<1x8x32xf32> to vector<8x32xf32>
    %c8 = arith.constant 8 : index
    %c0_16 = arith.constant 0 : index
    %c0_17 = arith.constant 0 : index
    %33 = vector.load %arg2[%c8, %c0_16, %c0_17] : memref<15x8x32xf32, #tpu.memory_space<vmem>>, vector<1x8x32xf32>
    %34 = vector.shape_cast %33 : vector<1x8x32xf32> to vector<8x32xf32>
    %35 = vector.broadcast %3 : vector<8x1xf32> to vector<8x32xf32>
    %36 = arith.mulf %35, %34 : vector<8x32xf32>
    %37 = math.sin %36 : vector<8x32xf32>
    %38 = arith.mulf %32, %37 : vector<8x32xf32>
    %39 = arith.addf %30, %38 : vector<8x32xf32>
    %40 = vector.extract_strided_slice %0 {offsets = [0, 3], sizes = [8, 1], strides = [1, 1]} : vector<8x4xf32> to vector<8x1xf32>
    %41 = arith.mulf %1, %40 : vector<8x1xf32>
    %c10 = arith.constant 10 : index
    %c0_18 = arith.constant 0 : index
    %c0_19 = arith.constant 0 : index
    %42 = vector.load %arg2[%c10, %c0_18, %c0_19] : memref<15x8x32xf32, #tpu.memory_space<vmem>>, vector<1x8x32xf32>
    %43 = vector.shape_cast %42 : vector<1x8x32xf32> to vector<8x32xf32>
    %c11 = arith.constant 11 : index
    %c0_20 = arith.constant 0 : index
    %c0_21 = arith.constant 0 : index
    %44 = vector.load %arg2[%c11, %c0_20, %c0_21] : memref<15x8x32xf32, #tpu.memory_space<vmem>>, vector<1x8x32xf32>
    %45 = vector.shape_cast %44 : vector<1x8x32xf32> to vector<8x32xf32>
    %46 = vector.broadcast %41 : vector<8x1xf32> to vector<8x32xf32>
    %47 = arith.mulf %46, %45 : vector<8x32xf32>
    %48 = arith.addf %43, %47 : vector<8x32xf32>
    %c12 = arith.constant 12 : index
    %c0_22 = arith.constant 0 : index
    %c0_23 = arith.constant 0 : index
    %49 = vector.load %arg2[%c12, %c0_22, %c0_23] : memref<15x8x32xf32, #tpu.memory_space<vmem>>, vector<1x8x32xf32>
    %50 = vector.shape_cast %49 : vector<1x8x32xf32> to vector<8x32xf32>
    %c13 = arith.constant 13 : index
    %c0_24 = arith.constant 0 : index
    %c0_25 = arith.constant 0 : index
    %51 = vector.load %arg2[%c13, %c0_24, %c0_25] : memref<15x8x32xf32, #tpu.memory_space<vmem>>, vector<1x8x32xf32>
    %52 = vector.shape_cast %51 : vector<1x8x32xf32> to vector<8x32xf32>
    %53 = vector.broadcast %3 : vector<8x1xf32> to vector<8x32xf32>
    %54 = arith.mulf %53, %52 : vector<8x32xf32>
    %55 = math.sin %54 : vector<8x32xf32>
    %56 = arith.mulf %50, %55 : vector<8x32xf32>
    %57 = arith.addf %48, %56 : vector<8x32xf32>
    %c4 = arith.constant 4 : index
    %c0_26 = arith.constant 0 : index
    %c0_27 = arith.constant 0 : index
    %58 = vector.load %arg2[%c4, %c0_26, %c0_27] : memref<15x8x32xf32, #tpu.memory_space<vmem>>, vector<1x8x32xf32>
    %59 = vector.shape_cast %58 : vector<1x8x32xf32> to vector<8x32xf32>
    %c9 = arith.constant 9 : index
    %c0_28 = arith.constant 0 : index
    %c0_29 = arith.constant 0 : index
    %60 = vector.load %arg2[%c9, %c0_28, %c0_29] : memref<15x8x32xf32, #tpu.memory_space<vmem>>, vector<1x8x32xf32>
    %61 = vector.shape_cast %60 : vector<1x8x32xf32> to vector<8x32xf32>
    %c14 = arith.constant 14 : index
    %c0_30 = arith.constant 0 : index
    %c0_31 = arith.constant 0 : index
    %62 = vector.load %arg2[%c14, %c0_30, %c0_31] : memref<15x8x32xf32, #tpu.memory_space<vmem>>, vector<1x8x32xf32>
    %63 = vector.shape_cast %62 : vector<1x8x32xf32> to vector<8x32xf32>
    %64 = arith.addf %59, %61 : vector<8x32xf32>
    %65 = arith.subf %57, %21 : vector<8x32xf32>
    %66 = arith.addf %65, %39 : vector<8x32xf32>
    %67 = arith.mulf %66, %66 : vector<8x32xf32>
    %cst_32 = arith.constant 1.000000e+00 : f32
    %68 = vector.broadcast %cst_32 : f32 to vector<8x32xf32>
    %69 = arith.divf %68, %63 : vector<8x32xf32>
    %cst_33 = arith.constant 1.000000e+00 : f32
    %70 = vector.broadcast %cst_33 : f32 to vector<8x32xf32>
    %71 = arith.divf %70, %64 : vector<8x32xf32>
    %72 = arith.addf %64, %67 : vector<8x32xf32>
    %73 = arith.mulf %72, %69 : vector<8x32xf32>
    %cst_34 = arith.constant dense<0.000000e+00> : vector<8xf32>
    %74 = vector.multi_reduction <add>, %73, %cst_34 [1] : vector<8x32xf32> to vector<8xf32>
    %75 = vector.shape_cast %74 : vector<8xf32> to vector<8x1xf32>
    %cst_35 = arith.constant 3.200000e+01 : f32
    %76 = vector.broadcast %cst_35 : f32 to vector<8x1xf32>
    %77 = arith.subf %75, %76 : vector<8x1xf32>
    %78 = arith.addf %63, %67 : vector<8x32xf32>
    %79 = arith.mulf %78, %71 : vector<8x32xf32>
    %cst_36 = arith.constant dense<0.000000e+00> : vector<8xf32>
    %80 = vector.multi_reduction <add>, %79, %cst_36 [1] : vector<8x32xf32> to vector<8xf32>
    %81 = vector.shape_cast %80 : vector<8xf32> to vector<8x1xf32>
    %cst_37 = arith.constant 3.200000e+01 : f32
    %82 = vector.broadcast %cst_37 : f32 to vector<8x1xf32>
    %83 = arith.subf %81, %82 : vector<8x1xf32>
    %84 = arith.addf %77, %83 : vector<8x1xf32>
    %cst_38 = arith.constant 2.500000e-01 : f32
    %85 = vector.broadcast %cst_38 : f32 to vector<8x1xf32>
    %86 = arith.mulf %84, %85 : vector<8x1xf32>
    %c0_39 = arith.constant 0 : index
    %c0_40 = arith.constant 0 : index
    %87 = vector.load %arg3[%c0_39, %c0_40] : memref<8x1xf32, #tpu.memory_space<vmem>>, vector<8x1xf32>
    tpu.vector_store %arg3[%c0_39, %c0_40], %86 {strides = array<i32>} : memref<8x1xf32, #tpu.memory_space<vmem>>, vector<8x1xf32>,
    return
  }
  func.func @transform_0(%arg0: i32) -> (i32, i32) {
    %c0_i32 = arith.constant 0 : i32
    %c0_i32_0 = arith.constant 0 : i32
    return %arg0, %c0_i32 : i32, i32
  }
  func.func @transform_1(%arg0: i32) -> (i32, i32, i32) {
    %c0_i32 = arith.constant 0 : i32
    %c0_i32_0 = arith.constant 0 : i32
    %c0_i32_1 = arith.constant 0 : i32
    return %c0_i32, %arg0, %c0_i32_0 : i32, i32, i32
  }
  func.func @transform_2(%arg0: i32) -> (i32, i32) {
    %c0_i32 = arith.constant 0 : i32
    %c0_i32_0 = arith.constant 0 : i32
    return %arg0, %c0_i32 : i32, i32
  }
}

</mosaic_0001>

<bundles_post_ra>
// kernel: tpu_custom_call.1
= control target key start
LH: loop header
LB: loop body
LE: loop exit
PB: predicated region body
PF: predicated region fallthrough
CT: control target
= control target key end

     0   :  { %7 = vsyncpa [#allocation3], 0  ;;  %s683_s12 = smov [#allocation2]   ;;  %s684_s14 = smov 128   ;;  %s1121_s0 = inlined_call_operand.vmem [shape: f32[8,4], index: 0, kind: input, shape index: {}]   ;;  %s1122_s1 = inlined_call_operand.hbm [shape: f32[15,8,32], index: 1, kind: input, shape index: {}]   ;;  %s1123_s2 = inlined_call_operand.vmem [shape: f32[8,1], index: 2, kind: output, shape index: {}]  }
   0x1   :  { %s14_s11 = sshll.u32 %s1122_s1, 4  ;;  %s16_s13 = sshll.u32 %s683_s12, 4  ;;  %s15_s11 = int_to_ptr.hbm [resolvable:$true] %s14_s11  ;;  %s17_s13 = int_to_ptr.vmem [resolvable:$true] %s16_s13 }
   0x2   :  { %s685_s15 = smov 8  }
   0x3   :  { %22 = dma.hbm_to_vmem [thread:$0]  %s15_s11, 1920, %s17_s13, [#allocation3], %s684_s14, %s684_s14, %s685_s15  }
   0x4   :  { %681 = dma.done.wait [#allocation3], 1920  }
   0x5   :  { %682 = vsyncadd [#allocation3], 4294965376  ;;  %v686_v0 = vmov 0   ;;  %v719_v1 = vld [vmem:[%s1121_s0] sm:$0xff]  ;;  %s687_s1 = smov 125   ;;  %s688_s18 = smov 126  }
   0x6   :  { %651 = vset.pattern.permute.xlu0 %v686_v0  ;;  %652 = vset.pattern.permute.xlu2 %v686_v0  ;;  %v28_v2 = vmul.f32 6.2831855, %v719_v1  ;;  %s689_s19 = smov 127   ;;  %v47_v3 = vld [vmem:[#allocation2 + $0x18] sm:$0xff]  ;;  %v229_v4 = vld [vmem:[#allocation2 + $0x40] sm:$0xff]  ;;  %v406_v10 = vld [vmem:[#allocation2 + $0x68] sm:$0xff] }
   0x7   :  { %388 = vrot.lane.b32.xlu1 %v719_v1, %s687_s1  ;;  %v690_v28 = vmov 683565275   ;;  %v691_v30 = vmov 2475754826   ;;  %v692_v32 = vmov 2131351028  }
   0x8   :  { %50 = vperm.xlu0 %651, %v28_v2   ;;  %v693_v34 = vmov 2102212464   ;;  %v694_v36 = vmov 920167782   ;;  %v695_v45 = vmov 1326507024  }
   0xf   :  { %211 = vrot.lane.b32.xlu1 %v719_v1, %s688_s18 }
  0x10   :  { %30 = vrot.lane.b32.xlu0 %v719_v1, %s689_s19 }
  0x7a   :  { %v51_v5 = vpop.permute.xlu0 %50 }
  0x7b   :  { %v725_v6 = vmul.f32 %v51_v5, %v47_v3  ;;  %v727_v7 = vmul.f32 %v229_v4, %v51_v5  ;;  %v733_v17 = vmul.f32 %v406_v10, %v51_v5 }
  0x7d   :  { %v57_v8 = vand.u32 2139095040, %v725_v6  ;;  %v234_v9 = vand.u32 2139095040, %v727_v7  ;;  %v54_v12 = vand.u32 2147483647, %v725_v6  ;;  %v231_v15 = vand.u32 2147483647, %v727_v7 }
  0x7e   :  { %v411_v23 = vand.u32 2139095040, %v733_v17  ;;  %v408_v59 = vand.u32 2147483647, %v733_v17 }
  0x7f   :  { %v58_v11 = vshrl.u32 %v57_v8, 23  ;;  %v235_v13 = vshrl.u32 %v234_v9, 23  ;;  %v61_v19 = vand.u32 8388607, %v54_v12  ;;  %v238_v22 = vand.u32 8388607, %v231_v15 }
  0x80   :  { %v412_v39 = vshrl.u32 %v411_v23, 23 }
  0x81   :  { %v627_v14 = vadd.s32 4294967169, %v58_v11  ;;  %v630_v16 = vadd.s32 4294967169, %v235_v13  ;;  %v62_v25 = vor.u32 8388608, %v61_v19  ;;  %v239_v38 = vor.u32 8388608, %v238_v22 }
  0x82   :  { %v633_v56 = vadd.s32 4294967169, %v412_v39  ;;  %v808_v19 = vand.u32 8388607, %v408_v59 }
  0x83   :  { %v64_v18 = vadd.s32 1, %v627_v14  ;;  %v241_v20 = vadd.s32 1, %v630_v16  ;;  %v761_v47 = vshll.u32 %v62_v25, 8  ;;  %v791_v63 = vshll.u32 %v239_v38, 8 }
  0x84   :  { %v418_v10 = vadd.s32 1, %v633_v56 }
  0x85   :  { %vm65_vm0 = vcmp.gt.s32.totalorder %v64_v18, 0  ;;  %vm242_vm1 = vcmp.gt.s32.totalorder %v241_v20, 0  ;;  %v103_v62 = vand.u32 65535, %v761_v47  ;;  %v104_v11 = vshrl.u32 %v761_v47, 16 }
  0x86   :  { %v66_v21 = vsel %vm65_vm0, %v64_v18, 0  ;;  %v243_v43 = vsel %vm242_vm1, %v241_v20, 0  ;;  %v804_v18 = vand.u32 65535, %v791_v63  ;;  %vm419_vm6 = vcmp.gt.s32.totalorder %v418_v10, 0 }
  0x87   :  { %v68_v24 = vand.u32 31, %v66_v21  ;;  %v740_v26 = vshrl.u32 %v66_v21, 5  ;;  %v245_v53 = vand.u32 31, %v243_v43 }
  0x89   :  { %v742_v27 = vsub.s32 32, %v68_v24  ;;  %v71_v29 = vshll.u32 %v690_v28, %v68_v24  ;;  %v74_v31 = vshll.u32 %v691_v30, %v68_v24  ;;  %v77_v33 = vshll.u32 %v692_v32, %v68_v24 }
  0x8a   :  { %v80_v35 = vshll.u32 %v693_v34, %v68_v24  ;;  %v83_v37 = vshll.u32 %v694_v36, %v68_v24  ;;  %vm86_vm2 = vcmp.lt.s32.totalorder %v740_v26, 1  ;;  %vm89_vm3 = vcmp.lt.s32.totalorder %v740_v26, 4 }
  0x8b   :  { %v72_v40 = vshrl.u32 %v691_v30, %v742_v27  ;;  %v75_v41 = vshrl.u32 %v692_v32, %v742_v27  ;;  %v78_v42 = vshrl.u32 %v693_v34, %v742_v27  ;;  %v81_v44 = vshrl.u32 %v694_v36, %v742_v27 }
  0x8c   :  { %v84_v46 = vshrl.u32 %v695_v45, %v742_v27  ;;  %vm88_vm4 = vcmp.lt.s32.totalorder %v740_v26, 3  ;;  %vm87_vm5 = vcmp.lt.s32.totalorder %v740_v26, 2  ;;  %v797_v4 = vsub.s32 32, %v245_v53 }
  0x8d   :  { %v763_v48 = vor.u32 %v72_v40, %v71_v29  ;;  %v765_v49 = vor.u32 %v75_v41, %v74_v31  ;;  %v767_v50 = vor.u32 %v78_v42, %v77_v33  ;;  %v82_v51 = vor.u32 %v81_v44, %v80_v35 }
  0x8e   :  { %v85_v52 = vor.u32 %v84_v46, %v83_v37  ;;  %v248_v16 = vshll.u32 %v690_v28, %v245_v53  ;;  %v249_v21 = vshrl.u32 %v691_v30, %v797_v4  ;;  %v251_v22 = vshll.u32 %v691_v30, %v245_v53 }
  0x8f   :  { %v94_v54 = vsel %vm86_vm2, %v763_v48, %v765_v49  ;;  %v98_v55 = vsel %vm86_vm2, %v765_v49, %v767_v50  ;;  %v95_v57 = vsel %vm89_vm3, %v82_v51, 920167782  ;;  %v252_v23 = vshrl.u32 %v692_v32, %v797_v4 }
  0x90   :  { %v99_v58 = vsel %vm89_vm3, %v85_v52, 1326507024  ;;  %v96_v60 = vsel %vm88_vm4, %v767_v50, %v95_v57  ;;  %v254_v29 = vshll.u32 %v692_v32, %v245_v53  ;;  %v255_v31 = vshrl.u32 %v693_v34, %v797_v4 }
  0x91   :  { %v100_v61 = vsel %vm88_vm4, %v82_v51, %v99_v58  ;;  %v97_v2 = vsel %vm87_vm5, %v94_v54, %v96_v60  ;;  %v70_v39 = vshrl.u32 %v690_v28, %v742_v27  ;;  %v828_v40 = vshrl.u32 %v243_v43, 5 }
  0x92   :  { %v101_v3 = vsel %vm87_vm5, %v98_v55, %v100_v61  ;;  %v128_v9 = vshrl.u32 %v97_v2, 16  ;;  %v127_v13 = vand.u32 65535, %v97_v2  ;;  %v257_v41 = vshll.u32 %v693_v34, %v245_v53 }
  0x93   :  { %v105_v5 = vand.u32 65535, %v101_v3  ;;  %v106_v8 = vshrl.u32 %v101_v3, 16  ;;  %v258_v46 = vshrl.u32 %v694_v36, %v797_v4  ;;  %v833_v52 = vor.u32 %v249_v21, %v248_v16 }
  0x94   :  { %v810_v20 = vmul.u32 %v128_v9, %v103_v62  ;;  %v129_v35 = vmul.u32 %v127_v13, %v103_v62  ;;  %v823_v37 = vmul.u32 %v127_v13, %v104_v11  ;;  %v835_v54 = vor.u32 %v252_v23, %v251_v22 }
  0x95   :  { %v800_v14 = vmul.u32 %v106_v8, %v103_v62  ;;  %v107_v24 = vmul.u32 %v105_v5, %v103_v62  ;;  %v821_v33 = vmul.u32 %v105_v5, %v104_v11  ;;  %v110_v51 = vmul.u32 %v106_v8, %v104_v11 }
  0x96   :  { %v133_v38 = vshll.u32 %v810_v20, 16  ;;  %v260_v55 = vshll.u32 %v694_v36, %v245_v53  ;;  %v132_v56 = vmul.u32 %v128_v9, %v104_v11  ;;  %v135_v43 = vshll.u32 %v823_v37, 16 }
  0x97   :  { %v111_v25 = vshll.u32 %v800_v14, 16  ;;  %v113_v27 = vshll.u32 %v821_v33, 16  ;;  %v256_v57 = vor.u32 %v255_v31, %v254_v29  ;;  %v259_v61 = vor.u32 %v258_v46, %v257_v41 }
  0x98   :  { %vm137_vm8 = vc.u32 %v129_v35, %v133_v38  ;;  %v139_v44 = vadd.s32 %v133_v38, %v129_v35  ;;  %v261_v62 = vshrl.u32 %v695_v45, %v797_v4  ;;  %vm263_vm11 = vcmp.lt.s32.totalorder %v828_v40, 1 }
  0x99   :  { %vm115_vm7 = vc.u32 %v107_v24, %v111_v25  ;;  %v117_v42 = vadd.s32 %v111_v25, %v107_v24  ;;  %v138_v60 = vsel %vm137_vm8, 1, %v686_v0  ;;  %vm265_vm12 = vcmp.lt.s32.totalorder %v828_v40, 3 }
  0x9a   :  { %v116_v58 = vsel %vm115_vm7, 1, %v686_v0  ;;  %vm141_vm10 = vc.u32 %v139_v44, %v135_v43  ;;  %v91_v53 = vsel %vm89_vm3, %v767_v50, 2102212464  ;;  %v262_v2 = vor.u32 %v261_v62, %v260_v55 }
  0x9b   :  { %vm119_vm9 = vc.u32 %v117_v42, %v113_v27  ;;  %vm264_vm13 = vcmp.lt.s32.totalorder %v828_v40, 2  ;;  %vm266_vm14 = vcmp.lt.s32.totalorder %v828_v40, 4  ;;  %v118_v3 = vadd.s32 %v116_v58, %v110_v51 }
  0x9c   :  { %v140_v5 = vadd.s32 %v138_v60, %v132_v56  ;;  %v271_v8 = vsel %vm263_vm11, %v833_v52, %v835_v54  ;;  %v272_v9 = vsel %vm266_vm14, %v259_v61, 920167782  ;;  %v120_v11 = vsel %vm119_vm9, 1, %v686_v0 }
  0x9d   :  { %v142_v13 = vsel %vm141_vm10, 1, %v686_v0  ;;  %v273_v50 = vsel %vm265_vm12, %v256_v57, %v272_v9  ;;  %v275_v16 = vsel %vm263_vm11, %v835_v54, %v256_v57  ;;  %v276_v22 = vsel %vm266_vm14, %v262_v2, 1326507024 }
  0x9e   :  { %v274_v21 = vsel %vm264_vm13, %v271_v8, %v273_v50  ;;  %v281_v23 = vshrl.u32 %v791_v63, 16  ;;  %v420_v24 = vsel %vm419_vm6, %v418_v10, 0  ;;  %v873_v25 = vsel %vm86_vm2, %v70_v39, %v763_v48 }
  0x9f   :  { %v878_v29 = vsel %vm88_vm4, %v765_v49, %v91_v53  ;;  %v277_v31 = vsel %vm265_vm12, %v259_v61, %v276_v22  ;;  %v304_v35 = vand.u32 65535, %v274_v21  ;;  %v122_v38 = vadd.s32 %v120_v11, %v118_v3 }
  0xa0   :  { %v144_v41 = vadd.s32 %v142_v13, %v140_v5  ;;  %v278_v42 = vsel %vm264_vm13, %v275_v16, %v277_v31  ;;  %v305_v10 = vshrl.u32 %v274_v21, 16  ;;  %v112_v46 = vshrl.u32 %v800_v14, 16 }
  0xa1   :  { %v247_v48 = vshrl.u32 %v690_v28, %v797_v4  ;;  %v282_v39 = vand.u32 65535, %v278_v42  ;;  %v283_v51 = vshrl.u32 %v278_v42, 16  ;;  %v114_v49 = vshrl.u32 %v821_v33, 16 }
  0xa2   :  { %v134_v55 = vshrl.u32 %v810_v20, 16  ;;  %v307_v27 = vmul.u32 %v305_v10, %v804_v18  ;;  %v308_v56 = vmul.u32 %v304_v35, %v281_v23  ;;  %v136_v58 = vshrl.u32 %v823_v37, 16 }
  0xa3   :  { %v891_v60 = vadd.s32 %v139_v44, %v135_v43  ;;  %v285_v61 = vmul.u32 %v283_v51, %v804_v18  ;;  %v286_v62 = vmul.u32 %v282_v39, %v281_v23  ;;  %v123_v14 = vadd.s32 %v122_v38, %v112_v46 }
  0xa4   :  { %v145_v53 = vadd.s32 %v144_v41, %v134_v55  ;;  %v306_v4 = vmul.u32 %v304_v35, %v804_v18  ;;  %v310_v2 = vshll.u32 %v307_v27, 16  ;;  %v268_v33 = vsel %vm266_vm14, %v256_v57, 2102212464 }
  0xa5   :  { %v284_v20 = vmul.u32 %v282_v39, %v804_v18  ;;  %v288_v3 = vshll.u32 %v285_v61, 16  ;;  %v309_v5 = vmul.u32 %v305_v10, %v281_v23  ;;  %v287_v8 = vmul.u32 %v283_v51, %v281_v23 }
  0xa6   :  { %v312_v9 = vshll.u32 %v308_v56, 16  ;;  %vm314_vm15 = vc.u32 %v306_v4, %v310_v2  ;;  %v316_v37 = vadd.s32 %v310_v2, %v306_v4  ;;  %v290_v44 = vshll.u32 %v286_v62, 16 }
  0xa7   :  { %vm292_vm0 = vc.u32 %v284_v20, %v288_v3  ;;  %v294_v43 = vadd.s32 %v288_v3, %v284_v20  ;;  %v315_v11 = vsel %vm314_vm15, 1, %v686_v0  ;;  %v146_v13 = vadd.s32 %v145_v53, %v136_v58 }
  0xa8   :  { %v293_v50 = vsel %vm292_vm0, 1, %v686_v0  ;;  %v317_v16 = vadd.s32 %v315_v11, %v309_v5  ;;  %vm318_vm1 = vc.u32 %v316_v37, %v312_v9  ;;  %v267_v18 = vsel %vm263_vm11, %v247_v48, %v833_v52 }
  0xa9   :  { %v295_v57 = vadd.s32 %v293_v50, %v287_v8  ;;  %vm296_vm2 = vc.u32 %v294_v43, %v290_v44  ;;  %v319_v21 = vsel %vm318_vm1, 1, %v686_v0  ;;  %v311_v23 = vshrl.u32 %v307_v27, 16 }
  0xaa   :  { %v297_v22 = vsel %vm296_vm2, 1, %v686_v0  ;;  %v321_v31 = vadd.s32 %v319_v21, %v317_v16  ;;  %v422_v35 = vand.u32 31, %v420_v24  ;;  %v905_v38 = vadd.s32 %v123_v14, %v114_v49 }
  0xab   :  { %v269_v41 = vsel %vm265_vm12, %v835_v54, %v268_v33  ;;  %v289_v42 = vshrl.u32 %v285_v61, 16  ;;  %v299_v10 = vadd.s32 %v297_v22, %v295_v57  ;;  %v150_v46 = vadd.s32 1, %v146_v13  ;;  %v920_v61 = vpop.permute.xlu1 %388 }
  0xac   :  { %v313_v39 = vshrl.u32 %v308_v56, 16  ;;  %v322_v52 = vadd.s32 %v321_v31, %v311_v23  ;;  %v910_v48 = vsub.s32 32, %v422_v35  ;;  %v291_v51 = vshrl.u32 %v286_v62, 16 }
  0xad   :  { %v300_v55 = vadd.s32 %v299_v10, %v289_v42  ;;  %v425_v58 = vshll.u32 %v690_v28, %v422_v35  ;;  %v428_v27 = vshll.u32 %v691_v30, %v422_v35  ;;  %v914_v49 = vshrl.u32 %v420_v24, 5 }
  0xae   :  { %v323_v53 = vadd.s32 %v322_v52, %v313_v39  ;;  %v426_v14 = vshrl.u32 %v691_v30, %v910_v48  ;;  %v429_v54 = vshrl.u32 %v692_v32, %v910_v48  ;;  %v431_v62 = vshll.u32 %v692_v32, %v422_v35 }
  0xaf   :  { %v922_v56 = vadd.s32 %v300_v55, %v291_v51  ;;  %v432_v4 = vshrl.u32 %v693_v34, %v910_v48  ;;  %v434_v2 = vshll.u32 %v693_v34, %v422_v35  ;;  %v93_v24 = vsel %vm87_vm5, %v873_v25, %v878_v29 }
  0xb0   :  { %vm149_vm3 = vc.u32 %v905_v38, %v891_v60  ;;  %v270_v30 = vsel %vm264_vm13, %v267_v18, %v269_v41  ;;  %v936_v33 = vadd.s32 %v316_v37, %v312_v9  ;;  %v327_v20 = vadd.s32 1, %v323_v53 }
  0xb1   :  { %v938_v32 = vor.u32 %v426_v14, %v425_v58  ;;  %v940_v3 = vor.u32 %v429_v54, %v428_v27  ;;  %v435_v34 = vshrl.u32 %v694_v36, %v910_v48  ;;  %v437_v26 = vshll.u32 %v694_v36, %v422_v35 }
  0xb2   :  { %vm326_vm4 = vc.u32 %v922_v56, %v936_v33  ;;  %v438_v25 = vshrl.u32 %v695_v45, %v910_v48  ;;  %vm440_vm5 = vcmp.lt.s32.totalorder %v914_v49, 1  ;;  %v151_v40 = vsel %vm149_vm3, %v150_v46, %v146_v13 }
  0xb3   :  { %v950_v29 = vor.u32 %v432_v4, %v431_v62  ;;  %v436_v5 = vor.u32 %v435_v34, %v434_v2  ;;  %vm443_vm6 = vcmp.lt.s32.totalorder %v914_v49, 4  ;;  %v147_v8 = vmul.u32 %v761_v47, %v93_v24  ;;  %v212_v21 = vpop.permute.xlu1 %211 }
  0xb4   :  { %v416_v9 = vor.u32 8388608, %v808_v19  ;;  %v439_v37 = vor.u32 %v438_v25, %v437_v26  ;;  %vm442_vm7 = vcmp.lt.s32.totalorder %v914_v49, 3  ;;  %v328_v44 = vsel %vm326_vm4, %v327_v20, %v323_v53 }
  0xb5   :  { %vm441_vm8 = vcmp.lt.s32.totalorder %v914_v49, 2  ;;  %v448_v36 = vsel %vm440_vm5, %v938_v32, %v940_v3  ;;  %v449_v45 = vsel %vm443_vm6, %v436_v5, 920167782  ;;  %v152_v43 = vadd.s32 %v151_v40, %v147_v8 }
  0xb6   :  { %v324_v11 = vmul.u32 %v791_v63, %v270_v30  ;;  %v450_v47 = vsel %vm442_vm7, %v950_v29, %v449_v45  ;;  %v452_v19 = vsel %vm440_vm5, %v940_v3, %v950_v29  ;;  %v453_v13 = vsel %vm443_vm6, %v439_v37, 1326507024 }
  0xb7   :  { %v451_v16 = vsel %vm441_vm8, %v448_v36, %v450_v47  ;;  %v454_v18 = vsel %vm442_vm7, %v436_v5, %v453_v13  ;;  %v979_v57 = vshll.u32 %v416_v9, 8  ;;  %v153_v22 = vadd.s32 536870912, %v152_v43  ;;  %v31_v5 = vpop.permute.xlu0 %30 }
  0xb8   :  { %v329_v50 = vadd.s32 %v328_v44, %v324_v11  ;;  %v455_v63 = vsel %vm441_vm8, %v452_v19, %v454_v18  ;;  %v482_v42 = vshrl.u32 %v451_v16, 16  ;;  %v214_v46 = vmul.f32 %v212_v21, %v719_v1 }
  0xb9   :  { %v459_v23 = vand.u32 65535, %v455_v63  ;;  %v460_v31 = vshrl.u32 %v455_v63, 16  ;;  %v457_v35 = vand.u32 65535, %v979_v57  ;;  %v458_v41 = vshrl.u32 %v979_v57, 16 }
  0xba   :  { %v330_v10 = vadd.s32 536870912, %v329_v50  ;;  %v984_v52 = vshrl.u32 %v153_v22, 30  ;;  %221 = vperm.xlu0 %651, %v214_v46   ;;  %v481_v27 = vand.u32 65535, %v451_v16  ;;  %v33_v47 = vmul.f32 %v31_v5, %v719_v1 }
  0xbb   :  { %v462_v39 = vmul.u32 %v460_v31, %v457_v35  ;;  %v463_v51 = vmul.u32 %v459_v23, %v458_v41  ;;  %v461_v55 = vmul.u32 %v459_v23, %v457_v35  ;;  %v484_v53 = vmul.u32 %v482_v42, %v457_v35 }
  0xbc   :  { %v986_v14 = vshrl.u32 %v330_v10, 30  ;;  %v464_v54 = vmul.u32 %v460_v31, %v458_v41  ;;  %v155_v2 = vshll.u32 %v984_v52, 30  ;;  %v483_v34 = vmul.u32 %v481_v27, %v457_v35  ;;  %39 = vperm.xlu2 %652, %v33_v47  }
  0xbd   :  { %v465_v58 = vshll.u32 %v462_v39, 16  ;;  %v467_v62 = vshll.u32 %v463_v51, 16  ;;  %v487_v30 = vshll.u32 %v484_v53, 16  ;;  %v485_v26 = vmul.u32 %v481_v27, %v458_v41 }
  0xbe   :  { %v332_v25 = vshll.u32 %v986_v14, 30  ;;  %v992_v9 = vsub.s32 %v152_v43, %v155_v2  ;;  %v466_v37 = vshrl.u32 %v462_v39, 16  ;;  %v486_v44 = vmul.u32 %v482_v42, %v458_v41 }
  0xbf   :  { %vm469_vm9 = vc.u32 %v461_v55, %v465_v58  ;;  %v471_v4 = vadd.s32 %v465_v58, %v461_v55  ;;  %vm491_vm11 = vc.u32 %v483_v34, %v487_v30  ;;  %v489_v36 = vshll.u32 %v485_v26, 16 }
  0xc0   :  { %v470_v24 = vsel %vm469_vm9, 1, %v686_v0  ;;  %v492_v45 = vsel %vm491_vm11, 1, %v686_v0  ;;  %v493_v11 = vadd.s32 %v487_v30, %v483_v34  ;;  %v996_v19 = vsub.s32 %v329_v50, %v332_v25 }
  0xc1   :  { %v472_v20 = vadd.s32 %v470_v24, %v464_v54  ;;  %vm473_vm10 = vc.u32 %v471_v4, %v467_v62  ;;  %v424_v13 = vshrl.u32 %v690_v28, %v910_v48  ;;  %v494_v18 = vadd.s32 %v492_v45, %v486_v44 }
  0xc2   :  { %v474_v40 = vsel %vm473_vm10, 1, %v686_v0  ;;  %v445_v43 = vsel %vm443_vm6, %v950_v29, 2102212464  ;;  %vm495_vm12 = vc.u32 %v493_v11, %v489_v36  ;;  %v468_v63 = vshrl.u32 %v463_v51, 16 }
  0xc3   :  { %v476_v8 = vadd.s32 %v474_v40, %v472_v20  ;;  %v496_v21 = vsel %vm495_vm12, 1, %v686_v0  ;;  %v158_v22 = vsub.s32 0, %v992_v9  ;;  %v488_v23 = vshrl.u32 %v484_v53, 16 }
  0xc4   :  { %v498_v31 = vadd.s32 %v496_v21, %v494_v18  ;;  %v335_v50 = vsub.s32 0, %v996_v19  ;;  %v444_v28 = vsel %vm440_vm5, %v424_v13, %v938_v32  ;;  %v446_v48 = vsel %vm442_vm7, %v940_v3, %v445_v43 }
  0xc5   :  { %v477_v16 = vadd.s32 %v476_v8, %v466_v37  ;;  %vm157_vm13 = vcmp.lt.s32.totalorder %v992_v9, 0  ;;  %vm334_vm14 = vcmp.lt.s32.totalorder %v996_v19, 0  ;;  %v490_v0 = vshrl.u32 %v485_v26, 16 }
  0xc6   :  { %v499_v35 = vadd.s32 %v498_v31, %v488_v23  ;;  %v497_v41 = vadd.s32 %v493_v11, %v489_v36  ;;  %v391_v42 = vmul.f32 %v920_v61, %v719_v1  ;;  %v447_v10 = vsel %vm441_vm8, %v444_v28, %v446_v48 }
  0xc7   :  { %v478_v29 = vadd.s32 %v477_v16, %v468_v63  ;;  %v159_v32 = vsel %vm157_vm13, %v158_v22, %v992_v9  ;;  %v336_v39 = vsel %vm334_vm14, %v335_v50, %v996_v19  ;;  %v501_v51 = vmul.u32 %v979_v57, %v447_v10 }
  0xc8   :  { %v500_v46 = vadd.s32 %v499_v35, %v490_v0  ;;  %398 = vperm.xlu2 %652, %v391_v42   ;;  %v160_v55 = vclz %v159_v32  ;;  %v337_v58 = vclz %v336_v39  ;;  %v148_v11 = vadd.s32 %v891_v60, %v905_v38 }
  0xc9   :  { %vm503_vm15 = vc.u32 %v478_v29, %v497_v41  ;;  %v502_v47 = vadd.s32 %v497_v41, %v478_v29  ;;  %v325_v16 = vadd.s32 %v936_v33, %v922_v56  ;;  %vm410_vm4 = vcmp.lt.s32.totalorder %v733_v17, 0 }
  0xca   :  { %v504_v3 = vadd.s32 1, %v500_v46  ;;  %v628_v62 = vadd.s32 4294967294, %v160_v55  ;;  %v631_v1 = vadd.s32 4294967294, %v337_v58  ;;  %vm56_vm5 = vcmp.lt.s32.totalorder %v725_v6, 0 }
  0xcb   :  { %vm233_vm6 = vcmp.lt.s32.totalorder %v727_v7, 0  ;;  %vm1041_vm7 = vcmp.le.f32.partialorder %v408_v59, 0.7853982  ;;  %vm1047_vm8 = vcmp.le.f32.partialorder %v54_v12, 0.7853982 }
  0xcc   :  { %v505_v27 = vsel %vm503_vm15, %v504_v3, %v500_v46  ;;  %vm629_vm0 = vcmp.lt.s32.totalorder %v628_v62, 0  ;;  %vm632_vm1 = vcmp.lt.s32.totalorder %v631_v1, 0  ;;  %vm1053_vm9 = vcmp.le.f32.partialorder %v231_v15, 0.7853982 }
  0xcd   :  { %v506_v53 = vadd.s32 %v505_v27, %v501_v51  ;;  %v163_v2 = vsel %vm629_vm0, 0, %v628_v62  ;;  %v340_v24 = vsel %vm632_vm1, 0, %v631_v1 }
  0xce   :  { %v168_v57 = vsub.s32 4294967266, %v163_v2  ;;  %v345_v34 = vsub.s32 4294967266, %v340_v24  ;;  %v164_v37 = vsub.s32 32, %v163_v2  ;;  %v341_v44 = vsub.s32 32, %v340_v24 }
  0xcf   :  { %v507_v54 = vadd.s32 536870912, %v506_v53  ;;  %v165_v31 = vshll.u32 %v992_v9, %v163_v2  ;;  %v342_v48 = vshll.u32 %v996_v19, %v340_v24 }
  0xd0   :  { %v169_v40 = vadd.s32 127, %v168_v57  ;;  %v346_v5 = vadd.s32 127, %v345_v34  ;;  %v166_v21 = vshrl.u32 %v148_v11, %v164_v37  ;;  %v343_v22 = vshrl.u32 %v325_v16, %v341_v44 }
  0xd1   :  { %v1021_v61 = vshrl.u32 %v507_v54, 30  ;;  %v178_v11 = vsub.s32 4, %v984_v52 }
  0xd2   :  { %v170_v13 = vshll.u32 %v169_v40, 23  ;;  %v347_v18 = vshll.u32 %v346_v5, 23  ;;  %v167_v38 = vor.u32 %v166_v21, %v165_v31  ;;  %v344_v29 = vor.u32 %v343_v22, %v342_v48 }
  0xd3   :  { %v509_v49 = vshll.u32 %v1021_v61, 30  ;;  %v532_v16 = vsub.s32 4, %v1021_v61 }
  0xd4   :  { %v171_v28 = vor.u32 4788187, %v170_v13  ;;  %v348_v0 = vor.u32 4788187, %v347_v18  ;;  %v174_v10 = vcvt.s32.f32 %v167_v38  ;;  %v351_v46 = vcvt.s32.f32 %v344_v29 }
  0xd5   :  { %v510_v4 = vsub.s32 %v506_v53, %v509_v49 }
  0xd6   :  { %v172_v42 = vand.u32 2147483647, %v171_v28  ;;  %v349_v56 = vand.u32 2147483647, %v348_v0  ;;  %v533_v28 = vsel %vm410_vm4, %v532_v16, %v1021_v61  ;;  %v566_v0 = vld [vmem:[#allocation2 + $0x20] sm:$0xff] }
  0xd7   :  { %vm511_vm2 = vcmp.lt.s32.totalorder %v510_v4, 0  ;;  %v512_v30 = vsub.s32 0, %v510_v4 }
  0xd8   :  { %v175_v39 = vmul.f32 %v174_v10, %v172_v42  ;;  %v352_v3 = vmul.f32 %v351_v46, %v349_v56 }
  0xd9   :  { %v513_v20 = vsel %vm511_vm2, %v512_v30, %v510_v4 }
  0xda   :  { %v514_v26 = vclz %v513_v20  ;;  %v176_v9 = vxor.u32 2147483648, %v175_v39  ;;  %v353_v55 = vxor.u32 2147483648, %v352_v3 }
  0xdc   :  { %v634_v25 = vadd.s32 4294967294, %v514_v26  ;;  %v177_v58 = vsel %vm56_vm5, %v176_v9, %v175_v39  ;;  %v354_v27 = vsel %vm233_vm6, %v353_v55, %v352_v3 }
  0xdd   :  { %v180_v59 = vsel %vm1047_vm8, %v725_v6, %v177_v58  ;;  %v357_v12 = vsel %vm1053_vm9, %v727_v7, %v354_v27 }
  0xde   :  { %vm635_vm3 = vcmp.lt.s32.totalorder %v634_v25, 0  ;;  %v359_v2 = vmul.f32 %v357_v12, %v357_v12 }
  0xdf   :  { %v517_v8 = vsel %vm635_vm3, 0, %v634_v25  ;;  %vm551_vm3 = vweird.f32 %v733_v17 }
  0xe0   :  { %v518_v36 = vsub.s32 32, %v517_v8  ;;  %v522_v45 = vsub.s32 4294967266, %v517_v8  ;;  %v519_v50 = vshll.u32 %v510_v4, %v517_v8  ;;  %v182_v4 = vmul.f32 %v180_v59, %v180_v59 }
  0xe1   :  { %v367_v30 = vmul.f32 -0.00019511016, %v359_v2  ;;  %v360_v40 = vmul.f32 -0.001358992, %v359_v2 }
  0xe2   :  { %v523_v43 = vadd.s32 127, %v522_v45  ;;  %v520_v63 = vshrl.u32 %v502_v47, %v518_v36  ;;  %v190_v15 = vmul.f32 -0.00019511016, %v182_v4  ;;  %v183_v25 = vmul.f32 -0.001358992, %v182_v4 }
  0xe3   :  { %v368_v34 = vadd.f32 0.008332121, %v367_v30  ;;  %v361_v45 = vadd.f32 0.041655596, %v360_v40 }
  0xe4   :  { %v524_v23 = vshll.u32 %v523_v43, 23  ;;  %v521_v60 = vor.u32 %v520_v63, %v519_v50  ;;  %v191_v57 = vadd.f32 0.008332121, %v190_v15  ;;  %v184_v36 = vadd.f32 0.041655596, %v183_v25 }
  0xe5   :  { %v369_v37 = vmul.f32 %v368_v34, %v359_v2  ;;  %v355_v63 = vsub.s32 4, %v986_v14  ;;  %v362_v22 = vmul.f32 %v361_v45, %v359_v2  ;;  %v395_v45 = vld [vmem:[#allocation2 + $0x58] sm:$0xff] }
  0xe6   :  { %v525_v35 = vor.u32 4788187, %v524_v23  ;;  %v528_v33 = vcvt.s32.f32 %v521_v60  ;;  %v192_v8 = vmul.f32 %v191_v57, %v182_v4  ;;  %v185_v21 = vmul.f32 %v184_v36, %v182_v4 }
  0xe7   :  { %v370_v18 = vadd.f32 -0.16666654, %v369_v37  ;;  %v179_v23 = vsel %vm56_vm5, %v178_v11, %v984_v52  ;;  %v356_v38 = vsel %vm233_vm6, %v355_v63, %v986_v14  ;;  %v363_v42 = vadd.f32 -0.4999988, %v362_v22  ;;  %v36_v37 = vld [vmem:[#allocation2 + $0x8] sm:$0xff] }
  0xe8   :  { %v526_v41 = vand.u32 2147483647, %v525_v35  ;;  %v193_v13 = vadd.f32 -0.16666654, %v192_v8  ;;  %v568_v35 = vld [vmem:[#allocation2 + $0x48] sm:$0xff]  ;;  %v181_v29 = vsel %vm1047_vm8, 0, %v179_v23  ;;  %vm374_vm5 = vweird.f32 %v727_v7 }
  0xe9   :  { %v371_v48 = vmul.f32 %v370_v18, %v359_v2  ;;  %v535_v52 = vsel %vm1041_vm7, 0, %v533_v28  ;;  %v1084_v61 = vadd.f32 %v568_v35, %v566_v0  ;;  %v358_v46 = vsel %vm1053_vm9, 0, %v356_v38  ;;  %v34_v23 = vld [vmem:[#allocation2] sm:$0xff]  ;;  %v227_v35 = vld [vmem:[#allocation2 + $0x38] sm:$0xff] }
  0xea   :  { %v529_v32 = vmul.f32 %v528_v33, %v526_v41  ;;  %v194_v50 = vmul.f32 %v193_v13, %v182_v4  ;;  %v186_v41 = vadd.f32 -0.4999988, %v185_v21  ;;  %v1082_v33 = vld [vmem:[#allocation2 + $0x70] sm:$0xff]  ;;  %v198_v39 = vadd.s32 3, %v181_v29 }
  0xeb   :  { %v364_v9 = vmul.f32 %v363_v42, %v359_v2  ;;  %653 = vrcp.f32 %v1082_v33  ;;  %v218_v29 = vld [vmem:[#allocation2 + $0x30] sm:$0xff]  ;;  %vm595_vm6 = vweird.f32 %v1084_v61  ;;  %vm580_vm8 = vweird.f32 %v1082_v33 }
  0xec   :  { %v530_v51 = vxor.u32 2147483648, %v529_v32  ;;  %v195_v10 = vadd.f32 1.0, %v194_v50  ;;  %v187_v3 = vmul.f32 %v186_v41, %v182_v4  ;;  %655 = vrcp.f32 %v1084_v61 }
  0xed   :  { %v365_v62 = vadd.f32 1.0, %v364_v9 }
  0xee   :  { %v531_v19 = vsel %vm410_vm4, %v530_v51, %v529_v32  ;;  %v372_v32 = vadd.f32 1.0, %v371_v48  ;;  %v552_v51 = vadd.s32 3, %v535_v52  ;;  %v196_v58 = vmul.f32 %v195_v10, %v180_v59  ;;  %v45_v48 = vld [vmem:[#allocation2 + $0x10] sm:$0xff]  ;;  %v216_v10 = vld [vmem:[#allocation2 + $0x28] sm:$0xff] }
  0xef   :  { %v534_v1 = vsel %vm1041_vm7, %v733_v17, %v531_v19  ;;  %v375_v19 = vadd.s32 3, %v358_v46  ;;  %v188_v54 = vadd.f32 1.0, %v187_v3  ;;  %v382_v59 = vxor.u32 2147483648, %v365_v62 }
  0xf0   :  { %v536_v49 = vmul.f32 %v534_v1, %v534_v1  ;;  %v373_v27 = vmul.f32 %v372_v32, %v357_v12  ;;  %v553_v15 = vand.u32 3, %v552_v51  ;;  %vm197_vm4 = vweird.f32 %v725_v6 }
  0xf1   :  { %v1090_v57 = vpop.eup %653  ;;  %v584_v3 = vand.u32 2147483647, %v1082_v33  ;;  %v586_v51 = vand.u32 2147483648, %v1082_v33 }
  0xf2   :  { %v544_v24 = vmul.f32 -0.00019511016, %v536_v49  ;;  %v537_v26 = vmul.f32 -0.001358992, %v536_v49  ;;  %v379_v2 = vxor.u32 2147483648, %v373_v27  ;;  %v1092_v34 = vpop.eup %655  ;;  %vm555_vm11 = vcmp.eq.s32.totalorder %v553_v15, 0 }
  0xf3   :  { %vm558_vm13 = vcmp.eq.s32.totalorder %v553_v15, 2  ;;  %v576_v8 = vmul.f32 %v1090_v57, %v1082_v33  ;;  %vm554_vm0 = vcmp.lt.s32.totalorder %v553_v15, 2  ;;  %vm596_vm7 = vweird.f32 %v1092_v34 }
  0xf4   :  { %v545_v20 = vadd.f32 0.008332121, %v544_v24  ;;  %v538_v44 = vadd.f32 0.041655596, %v537_v26  ;;  %v199_v24 = vand.u32 3, %v198_v39  ;;  %v205_v26 = vxor.u32 2147483648, %v188_v54 }
  0xf5   :  { %v577_v22 = vsub.f32 1.0, %v576_v8  ;;  %vm581_vm9 = vweird.f32 %v1090_v57  ;;  %v599_v39 = vand.u32 2147483647, %v1084_v61 }
  0xf6   :  { %v546_v5 = vmul.f32 %v545_v20, %v536_v49  ;;  %v539_v43 = vmul.f32 %v538_v44, %v536_v49  ;;  %v376_v20 = vand.u32 3, %v375_v19  ;;  %vm200_vm10 = vcmp.lt.s32.totalorder %v199_v24, 2 }
  0xf7   :  { %vm201_vm12 = vcmp.eq.s32.totalorder %v199_v24, 0  ;;  %vm204_vm15 = vcmp.eq.s32.totalorder %v199_v24, 2  ;;  %v578_v52 = vmul.f32 %v1090_v57, %v577_v22  ;;  %v587_v24 = vor.u32 1.1754944e-38, %v586_v51 }
  0xf8   :  { %v547_v47 = vadd.f32 -0.16666654, %v546_v5  ;;  %v540_v60 = vadd.f32 -0.4999988, %v539_v43  ;;  %vm378_vm14 = vcmp.eq.s32.totalorder %v376_v20, 0  ;;  %v591_v5 = vmul.f32 %v1092_v34, %v1084_v61  ;;  %v393_v43 = vld [vmem:[#allocation2 + $0x50] sm:$0xff] }
  0xf9   :  { %v380_v40 = vsel %vm378_vm14, %v365_v62, %v379_v2  ;;  %vm381_vm1 = vcmp.eq.s32.totalorder %v376_v20, 2  ;;  %v206_v36 = vsel %vm204_vm15, %v205_v26, %v196_v58  ;;  %vm377_vm2 = vcmp.lt.s32.totalorder %v376_v20, 2 }
  0xfa   :  { %v548_v31 = vmul.f32 %v547_v47, %v536_v49  ;;  %v541_v14 = vmul.f32 %v540_v60, %v536_v49  ;;  %v202_v49 = vxor.u32 2147483648, %v196_v58  ;;  %v383_v47 = vsel %vm381_vm1, %v382_v59, %v373_v27 }
  0xfb   :  { %v384_v16 = vsel %vm377_vm2, %v380_v40, %v383_v47  ;;  %v592_v21 = vsub.f32 1.0, %v591_v5  ;;  %v579_v58 = vadd.f32 %v1090_v57, %v578_v52  ;;  %vm607_vm14 = vcmask 261120  }
  0xfc   :  { %v549_v56 = vadd.f32 1.0, %v548_v31  ;;  %v542_v53 = vadd.f32 1.0, %v541_v14  ;;  %v203_v25 = vsel %vm201_vm12, %v188_v54, %v202_v49  ;;  %v404_v31 = vld [vmem:[#allocation2 + $0x60] sm:$0xff]  ;;  %v385_v60 = vsel %vm374_vm5, nan, %v384_v16 }
  0xfd   :  { %v207_v13 = vsel %vm200_vm10, %v203_v25, %v206_v36  ;;  %v593_v17 = vmul.f32 %v1092_v34, %v592_v21  ;;  %v386_v6 = vmul.f32 %v385_v60, %v227_v35  ;;  %v601_v14 = vand.u32 2147483648, %v1084_v61  ;;  %vm597_vm10 = vmor %vm595_vm6, %vm596_vm7 }
  0xfe   :  { %v550_v55 = vmul.f32 %v549_v56, %v534_v1  ;;  %v559_v1 = vxor.u32 2147483648, %v542_v53  ;;  %v208_v0 = vsel %vm197_vm4, nan, %v207_v13  ;;  %vm600_vm12 = vcmp.eq.f32.partialorder %v599_v39, 8.507059e+37 }
  0xff   :  { %v209_v56 = vmul.f32 %v208_v0, %v45_v48  ;;  %v594_v19 = vadd.f32 %v1092_v34, %v593_v17  ;;  %v602_v54 = vor.u32 1.1754944e-38, %v601_v14  ;;  %vm620_vm15 = vcmask 7168  }
 0x100   :  { %v556_v30 = vxor.u32 2147483648, %v550_v55  ;;  %v560_v44 = vsel %vm558_vm13, %v559_v1, %v550_v55  ;;  %vm585_vm13 = vcmp.eq.f32.partialorder %v584_v3, 8.507059e+37 }
 0x101   :  { %v598_v62 = vsel %vm597_vm10, %v1092_v34, %v594_v19 }
 0x102   :  { %v557_v12 = vsel %vm555_vm11, %v542_v53, %v556_v30  ;;  %vm582_vm11 = vmor %vm580_vm8, %vm581_vm9  ;;  %v603_v49 = vsel %vm600_vm12, %v602_v54, %v598_v62 }
 0x103   :  { %v561_v11 = vsel %vm554_vm0, %v557_v12, %v560_v44  ;;  %v583_v30 = vsel %vm582_vm11, %v1090_v57, %v579_v58 }
 0x104   :  { %v562_v50 = vsel %vm551_vm3, nan, %v561_v11 }
 0x105   :  { %v563_v42 = vmul.f32 %v562_v50, %v404_v31 }
 0x116   :  { %v40_v4 = vpop.permute.xlu2 %39 }
 0x117   :  { %v42_v18 = vmul.f32 %v40_v4, %v36_v37  ;;  %v588_v4 = vsel %vm585_vm13, %v587_v24, %v583_v30 }
 0x119   :  { %v43_v41 = vadd.f32 %v42_v18, %v34_v23 }
 0x11b   :  { %v210_v9 = vadd.f32 %v209_v56, %v43_v41 }
 0x122   :  { %v399_v63 = vpop.permute.xlu2 %398 }
 0x123   :  { %v401_v28 = vmul.f32 %v399_v63, %v395_v45 }
 0x125   :  { %v402_v38 = vadd.f32 %v401_v28, %v393_v43 }
 0x127   :  { %v564_v7 = vadd.f32 %v563_v42, %v402_v38 }
 0x129   :  { %v572_v27 = vsub.f32 %v564_v7, %v210_v9 }
 0x12c   :  { %v222_v46 = vpop.permute.xlu0 %221 }
 0x12d   :  { %v224_v32 = vmul.f32 %v222_v46, %v218_v29 }
 0x12f   :  { %v225_v55 = vadd.f32 %v224_v32, %v216_v10 }
 0x131   :  { %v387_v53 = vadd.f32 %v386_v6, %v225_v55 }
 0x133   :  { %v573_v15 = vadd.f32 %v572_v27, %v387_v53 }
 0x135   :  { %v574_v20 = vmul.f32 %v573_v15, %v573_v15 }
 0x137   :  { %v612_v2 = vadd.f32 %v574_v20, %v1082_v33  ;;  %v605_v1 = vadd.f32 %v574_v20, %v1084_v61 }
 0x139   :  { %v613_v26 = vmul.f32 %v612_v2, %v603_v49  ;;  %v606_v59 = vmul.f32 %v605_v1, %v588_v4 }
 0x13b   :  { %v614_v12 = vsel %vm607_vm14, %v613_v26, 0.0  ;;  %v608_v25 = vsel %vm607_vm14, %v606_v59, 0.0 }
 0x13c   :  { %615 = vadd.xlane.f32.xlu2 %v614_v12  ;;  %609 = vadd.xlane.f32.xlu1 %v608_v25 }
 0x1af   :  { %v616_v40 = vpop.xlane.xlu2 %615  ;;  %v610_v5 = vpop.xlane.xlu1 %609 }
 0x1b0   :  { %v637_v34 = vadd.f32 -32.0, %v616_v40  ;;  %v636_v8 = vadd.f32 -32.0, %v610_v5 }
 0x1b2   :  { %v618_v57 = vadd.f32 %v637_v34, %v636_v8 }
 0x1b4   :  { %v619_v37 = vmul.f32 0.25, %v618_v57 }
 0x1b6   :  { %621 = vst.msk [vmem:[%s1123_s2] sm:$0xff] %vm620_vm15, %v619_v37 }
 0x1b7   :  { %626 = vsyncpa [#allocation3], 1 }

</bundles_post_ra>
